<compile_context>
chip_gen: v7x
topology: tpu7x:2x2x1
jax: 0.10.0
libtpu: 0.0.40
codegen_flags: <defaults>
</compile_context>

<pallas_src>
import jax
import jax.numpy as jnp
from jax import lax
from jax.experimental import pallas as pl
from jax.experimental.pallas import tpu as pltpu


def _bow_mlp_kernel(x_ref, w1_ref, b1_ref, w2_ref, b2_ref, out_ref):
    # x:  (TB, V)   w1: (H, V)   b1: (1, H)
    # w2: (V, H)    b2: (1, V)   out: (TB, V)
    x = x_ref[...]

    # fc1: contract x's feature dim (1) with w1's input dim (1) -> (TB, H).
    # Matches PyTorch nn.Linear: y = x @ W.T + b, without materializing W.T.
    h = lax.dot_general(
        x, w1_ref[...],
        dimension_numbers=(((1,), (1,)), ((), ())),
        preferred_element_type=jnp.float32,
    )
    h = jnp.maximum(h + b1_ref[...], 0.0)          # bias (f32) + ReLU

    # fc2: contract h's hidden dim (1) with w2's input dim (1) -> (TB, V).
    y = lax.dot_general(
        h.astype(w2_ref.dtype), w2_ref[...],
        dimension_numbers=(((1,), (1,)), ((), ())),
        preferred_element_type=jnp.float32,
    )
    out_ref[...] = (y + b2_ref[...]).astype(out_ref.dtype)


def bow_model_forward(x, w1, b1, w2, b2, *, batch_tile=None, use_bf16=False):
    """Pallas-fused equivalent of fc2(relu(fc1(x))).

    x:  (B, V)   w1: (H, V) (fc1.weight)   b1: (H,) (fc1.bias)
    w2: (V, H) (fc2.weight)                b2: (V,) (fc2.bias)
    returns (B, V) in x.dtype.

    batch_tile: if set (multiple of 8, dividing B, < B), runs a batch-tiled
                pipelined grid; otherwise a single gridless VMEM invocation.
    use_bf16:   cast x / weights to bf16 for the MXU (f32 accumulation kept).
    """
    B, V = x.shape
    H, V1 = w1.shape
    assert V1 == V and w2.shape == (V, H) and b1.shape == (H,) and b2.shape == (V,)

    compute_dtype = jnp.bfloat16 if use_bf16 else x.dtype
    x_c = x.astype(compute_dtype)
    w1_c = w1.astype(compute_dtype)
    w2_c = w2.astype(compute_dtype)
    # Biases stay f32 and are added to the f32 accumulators.
    b1r = b1.astype(jnp.float32).reshape(1, H)
    b2r = b2.astype(jnp.float32).reshape(1, V)

    out_shape = jax.ShapeDtypeStruct((B, V), x.dtype)

    small = (
        batch_tile is None
        or batch_tile >= B
        or (B % batch_tile) != 0
        or (batch_tile % 8) != 0
    )
    if small:
        # Single invocation: no grid, no pipeline machinery, no double
        # buffering — every operand is placed whole in VMEM and read once.
        vmem = pltpu.MemorySpace.VMEM
        return pl.pallas_call(
            _bow_mlp_kernel,
            out_shape=out_shape,
            in_specs=[pl.BlockSpec(memory_space=vmem)] * 5,
            out_specs=pl.BlockSpec(memory_space=vmem),
        )(x_c, w1_c, b1r, w2_c, b2r)

    # Batch-tiled path for production sizes: weights/biases stay resident
    # (constant index_map), x/out are pipelined per batch tile, and the batch
    # axis is "parallel" so v7x's two TensorCores split it (neutral on
    # v5e/v6e).  Block last dims use the full V / H extents, so the (8,128)
    # divisibility rule only binds on batch_tile (multiple of 8, enforced
    # above).  Keep batch_tile sized so weights + 2x double-buffered
    # (batch_tile, V) tiles fit v7x's 64 MiB VMEM.
    tb = batch_tile
    grid_spec = pl.GridSpec(
        grid=(B // tb,),
        in_specs=[
            pl.BlockSpec((tb, V), lambda i: (i, 0)),
            pl.BlockSpec((H, V), lambda i: (0, 0)),
            pl.BlockSpec((1, H), lambda i: (0, 0)),
            pl.BlockSpec((V, H), lambda i: (0, 0)),
            pl.BlockSpec((1, V), lambda i: (0, 0)),
        ],
        out_specs=pl.BlockSpec((tb, V), lambda i: (i, 0)),
    )
    return pl.pallas_call(
        _bow_mlp_kernel,
        out_shape=out_shape,
        grid_spec=grid_spec,
        compiler_params=pltpu.CompilerParams(
            dimension_semantics=("parallel",),
        ),
    )(x_c, w1_c, b1r, w2_c, b2r)


def reference_forward(x, w1, b1, w2, b2):
    h = jnp.maximum(x @ w1.T + b1, 0.0)
    return h @ w2.T + b2


if __name__ == "__main__":
    # Synthetic deterministic setup (the original script builds vocab from a
    # text corpus; we just pick a small vocab size).
    vocab_size = 32
    hidden_dim = 20
    batch = 4

    key = jax.random.PRNGKey(0)
    kx, kw1, kb1, kw2, kb2 = jax.random.split(key, 5)

    # Bag-of-words counts as input (non-negative), float32 like PyTorch default.
    x = jax.random.randint(kx, (batch, vocab_size), 0, 3).astype(jnp.float32)

    # Deterministic init mimicking nn.Linear's uniform(-1/sqrt(fan_in), 1/sqrt(fan_in)).
    bound1 = 1.0 / jnp.sqrt(jnp.float32(vocab_size))
    w1 = jax.random.uniform(kw1, (hidden_dim, vocab_size), jnp.float32, -bound1, bound1)
    b1 = jax.random.uniform(kb1, (hidden_dim,), jnp.float32, -bound1, bound1)
    bound2 = 1.0 / jnp.sqrt(jnp.float32(hidden_dim))
    w2 = jax.random.uniform(kw2, (vocab_size, hidden_dim), jnp.float32, -bound2, bound2)
    b2 = jax.random.uniform(kb2, (vocab_size,), jnp.float32, -bound2, bound2)

    out = bow_model_forward(x, w1, b1, w2, b2)  # small path: gridless, f32
    out = jax.block_until_ready(out)

    ref = reference_forward(x, w1, b1, w2, b2)
    assert out.shape == (batch, vocab_size)
    assert jnp.allclose(out, ref, atol=1e-5, rtol=1e-5), "mismatch vs reference"

    print("KERNEL_OK")
</pallas_src>

<mosaic_0001>
module attributes {stable_mosaic.version = 11 : i64} {
  func.func @_bow_mlp_kernel(%arg0: memref<4x32xf32, #tpu.memory_space<vmem>>, %arg1: memref<20x32xf32, #tpu.memory_space<vmem>>, %arg2: memref<1x20xf32, #tpu.memory_space<vmem>>, %arg3: memref<32x20xf32, #tpu.memory_space<vmem>>, %arg4: memref<1x32xf32, #tpu.memory_space<vmem>>, %arg5: memref<4x32xf32, #tpu.memory_space<vmem>>) attributes {dimension_semantics = [], scalar_prefetch = 0 : i64, scratch_operands = 0 : i64, tpu.core_type = #tpu.core_type<tc>} {
    %c0 = arith.constant 0 : index
    %c0_0 = arith.constant 0 : index
    %0 = vector.load %arg0[%c0, %c0_0] : memref<4x32xf32, #tpu.memory_space<vmem>>, vector<4x32xf32>
    %c0_1 = arith.constant 0 : index
    %c0_2 = arith.constant 0 : index
    %1 = vector.load %arg1[%c0_1, %c0_2] : memref<20x32xf32, #tpu.memory_space<vmem>>, vector<20x32xf32>
    %cst = arith.constant dense<0.000000e+00> : vector<4x20xf32>
    %2 = tpu.matmul %0, %1, %cst {dimension_numbers = #tpu.dot_dimension_numbers<[1], [1], [0], [0], [0, 0, 1, 0], [], []>} : vector<4x32xf32>, vector<20x32xf32>, vector<4x20xf32> -> vector<4x20xf32>
    %c0_3 = arith.constant 0 : index
    %c0_4 = arith.constant 0 : index
    %3 = vector.load %arg2[%c0_3, %c0_4] : memref<1x20xf32, #tpu.memory_space<vmem>>, vector<1x20xf32>
    %4 = vector.broadcast %3 : vector<1x20xf32> to vector<4x20xf32>
    %5 = arith.addf %2, %4 : vector<4x20xf32>
    %cst_5 = arith.constant 0.000000e+00 : f32
    %6 = vector.broadcast %cst_5 : f32 to vector<4x20xf32>
    %7 = arith.maximumf %5, %6 : vector<4x20xf32>
    %c0_6 = arith.constant 0 : index
    %c0_7 = arith.constant 0 : index
    %8 = vector.load %arg3[%c0_6, %c0_7] : memref<32x20xf32, #tpu.memory_space<vmem>>, vector<32x20xf32>
    %cst_8 = arith.constant dense<0.000000e+00> : vector<4x32xf32>
    %9 = tpu.matmul %7, %8, %cst_8 {dimension_numbers = #tpu.dot_dimension_numbers<[1], [1], [0], [0], [0, 0, 1, 0], [], []>} : vector<4x20xf32>, vector<32x20xf32>, vector<4x32xf32> -> vector<4x32xf32>
    %c0_9 = arith.constant 0 : index
    %c0_10 = arith.constant 0 : index
    %10 = vector.load %arg4[%c0_9, %c0_10] : memref<1x32xf32, #tpu.memory_space<vmem>>, vector<1x32xf32>
    %11 = vector.broadcast %10 : vector<1x32xf32> to vector<4x32xf32>
    %12 = arith.addf %9, %11 : vector<4x32xf32>
    %c0_11 = arith.constant 0 : index
    %c0_12 = arith.constant 0 : index
    %13 = vector.load %arg5[%c0_11, %c0_12] : memref<4x32xf32, #tpu.memory_space<vmem>>, vector<4x32xf32>
    tpu.vector_store %arg5[%c0_11, %c0_12], %12 {strides = array<i32>} : memref<4x32xf32, #tpu.memory_space<vmem>>, vector<4x32xf32>,
    return
  }
}

</mosaic_0001>

<bundles_post_ra>
// kernel: tpu_custom_call.1
= control target key start
LH: loop header
LB: loop body
LE: loop exit
PB: predicated region body
PF: predicated region fallthrough
CT: control target
= control target key end

     0   :  { %vm32_vm0 = vcmask 261120   ;;  %v309_v2 = vmov 0.0|0.0   ;;  %vm310_vm2 = vmmov 0   ;;  %v311_v4 = vmov 0.0   ;;  %s392_s0 = inlined_call_operand.vmem [shape: f32[4,32], index: 0, kind: input, shape index: {}]   ;;  %s393_s1 = inlined_call_operand.vmem [shape: f32[20,32], index: 1, kind: input, shape index: {}]   ;;  %s394_s2 = inlined_call_operand.vmem [shape: f32[1,20], index: 2, kind: input, shape index: {}]   ;;  %s395_s3 = inlined_call_operand.vmem [shape: f32[32,20], index: 3, kind: input, shape index: {}]   ;;  %s396_s4 = inlined_call_operand.vmem [shape: f32[1,32], index: 4, kind: input, shape index: {}]   ;;  %s397_s5 = inlined_call_operand.hbm [shape: f32[4,32], index: 5, kind: output, shape index: {}]  }
   0x1   :  { %v22_v0 = vld [vmem:[%s393_s1] sm:$0xff]  ;;  %v23_v1 = vld [vmem:[%s393_s1 + $0x8] sm:$0xff]  ;;  %269 = vmatprep.subr.bf16.mxu0 %v309_v2  ;;  %vm271_vm1 = vmpackc.low %vm32_vm0, %vm32_vm0  ;;  %255 = vmatprep.mubr.msk.f32.mxu0 %vm310_vm2, %v311_v4  ;;  %vm127_vm3 = vcmask 162816  }
   0x2   :  { %v270_v3 = vpack.c.bf16 %v23_v1, %v22_v0  ;;  %273 = vmatprep.subr.bf16.mxu1 %v309_v2  ;;  %v116_v5 = vld [vmem:[%s395_s3] sm:$0xff]  ;;  %v117_v6 = vld [vmem:[%s395_s3 + $0x8] sm:$0xff]  ;;  %vm275_vm4 = vmpackc.low %vm127_vm3, %vm127_vm3  ;;  %266 = vmatprep.mubr.msk.f32.mxu1 %vm310_vm2, %v311_v4 }
   0x3   :  { %v274_v7 = vpack.c.bf16 %v117_v6, %v116_v5 }
   0x4   :  { %272 = vmatpush3.bf16.xpose.msk.msra.mxu0 %vm271_vm1, %v270_v3 }
   0x5   :  { %253 = vmatprep.subr.mxu0 %v311_v4 }
   0x6   :  { %10 = vsyncpa [#allocation3], 0  ;;  %276 = vmatpush3.bf16.xpose.msk.msra.mxu1 %vm275_vm4, %v274_v7  ;;  %v118_v8 = vld [vmem:[%s395_s3 + $0x10] sm:$0xff]  ;;  %v119_v9 = vld [vmem:[%s395_s3 + $0x18] sm:$0xff]  ;;  %s312_s11 = smov [#allocation2]   ;;  %vm213_vm5 = vcmask 257024  }
   0x7   :  { %277 = vmatprep.subr.bf16.mxu1 %v309_v2  ;;  %v24_v10 = vld [vmem:[%s393_s1 + $0x10] sm:$0xf]  ;;  %v278_v11 = vpack.c.bf16 %v119_v9, %v118_v8  ;;  %v21_v12 = vld [vmem:[%s392_s0] sm:$0xf]  ;;  %s221_s12 = sshll.u32 %s312_s11, 4  ;;  %s222_s12 = int_to_ptr.vmem [resolvable:$true] %s221_s12 }
   0x8   :  { %v229_v13 = vld [vmem:[%s394_s2] ss:$0 sm:$0xff]  ;;  %s285_s0 = scalar_lea.vmem %s222_s12, 64  ;;  %p290_p1 = scmp.lt.s32.totalorder %s222_s12, %s222_s12 }
   0x9   :  { %v234_v18 = vld [vmem:[%s396_s4] ss:$0 sm:$0xff]  ;;  %p286_p0 = scmp.ne.s32.totalorder %s222_s12, %s285_s0  ;;  %p291_p2 = scmp.lt.s32.totalorder %s285_s0, %s285_s0 }
   0xb   :  { %p292_p3 = por %p291_p2, %p290_p1 }
   0xc   :  { %254 = vmatpush3.xpose.msk.msra.mxu0 %vm32_vm0, %v24_v10 }
   0xd   :  { %p293_p4 = pnand %p292_p3, %p286_p0 }
   0xe   :  { %280 = vmatpush3.bf16.xpose.msk.msra.mxu1 %vm275_vm4, %v278_v11 }
   0xf   :  { %256 = vmatmul.mubr.msk.f32.vlgmr.msra.gmra.mrb[0].mxu0 %vm32_vm0, %v21_v12 }
  0xe2   :  { %v111_v14 = vpop.f32.mrb[0].mxu0 }
  0xe3   :  { %v112_v15 = vadd.f32 %v229_v13, %v111_v14  ;;  %v257_v16 = vpop.f32.mrb[1].mxu0 }
  0xe5   :  { %v115_v17 = vmax.f32 %v112_v15, 0.0 }
  0xe7   :  { %267 = vmatmul.mubr.msk.f32.vlgmr.msra.gmra.mrb[0].mxu1 %vm127_vm3, %v115_v17 }
 0x1ba   :  { %v209_v19 = vpop.f32.mrb[0].mxu1 }
 0x1bb   :  { %v210_v20 = vadd.f32 %v234_v18, %v209_v19  ;;  %v268_v21 = vpop.f32.mrb[1].mxu1 }
 0x1bd   :  { %214 = vst.msk [vmem:[#allocation2] sm:$0xf] %vm213_vm5, %v210_v20 }
 0x1be   :  { %296 = shalt.err (!%p293_p4)
}
 0x1bf   :  { %s297_s14 = scalar_lea.hbm %s397_s5, 64 }
 0x1c0   :  { %p298_p5 = scmp.ne.s32.totalorder %s397_s5, %s297_s14  ;;  %p301_p6 = scmp.lt.u32.totalorder %s297_s14, %s397_s5 }
 0x1c2   :  { %p303_p7 = pnand %p301_p6, %p298_p5 }
 0x1c4   :  { %306 = shalt.err (!%p303_p7)
}
 0x1c5   :  { %224 = dma.vmem_to_hbm [thread:$0]  %s222_s12, 64, %s397_s5, [#allocation3]  }
 0x1c6   :  { %307 = dma.done.wait [#allocation3], 64  }
 0x1c7   :  { %308 = vsyncadd [#allocation3], 4294967232 }
 0x1c8   :  { %228 = vsyncpa [#allocation3], 1 }

</bundles_post_ra>
